<compile_context>
chip_gen: v5e
topology: v5e:2x2
jax: 0.10.0
libtpu: 0.0.40
codegen_flags: <defaults>
</compile_context>

<pallas_src>
import jax
import jax.numpy as jnp
from jax.experimental import pallas as pl
from jax.experimental.pallas import tpu as pltpu

NEG_SLOPE = 0.01  # PyTorch nn.LeakyReLU default


def _textcnn_kernel(x_ref, mask_ref, w_ref, b_ref, fcw_ref, fcb_ref, out_ref):
    """x_ref:(TB,L_pad,K) bf16 im2col slab; w_ref:(K,N_pad) bf16 fused conv weights;
    b_ref:(1,N_pad) f32; mask_ref:(L_pad,N_pad) f32 additive -inf mask;
    fcw_ref:(N_pad,C_pad) bf16; fcb_ref:(1,C_pad) f32; out_ref:(TB,C_pad) f32."""
    TB, L_pad, K = x_ref.shape
    N_pad = w_ref.shape[-1]

    # All conv windows as ONE MXU matmul (K = h_max*E fills the contraction axis).
    xs = x_ref[...].reshape(TB * L_pad, K)                              # bf16
    conv = jnp.dot(xs, w_ref[...], preferred_element_type=jnp.float32)  # (TB*L_pad, N_pad) f32
    conv = conv + b_ref[...]                                            # fused bias

    # LeakyReLU, then mask invalid (tail / padded) positions and max-pool over length.
    act = jnp.where(conv > 0, conv, NEG_SLOPE * conv)
    act = act.reshape(TB, L_pad, N_pad) + mask_ref[...]                 # -1e30 on invalid rows
    pooled = jnp.max(act, axis=1)                                       # (TB, N_pad) f32

    # TODO(synk): nn.Dropout(p=0.5) is identity at inference; training-mode masking
    #             would use pltpu.prng_seed / pltpu.prng_random_bits.

    logits = jnp.dot(pooled.astype(fcw_ref.dtype), fcw_ref[...],
                     preferred_element_type=jnp.float32) + fcb_ref[...]
    out_ref[...] = logits                                               # (TB, C_pad) lane-dense


def textcnn_forward(token_ids, embed_table, conv_ws, conv_bs, fc_w, fc_b, windows_size,
                    *, batch_tile=8):
    """token_ids: (B, L) int32.  conv_ws[i]: (h_i, E, F)  (= PyTorch (F, E, h) transposed
    (2,1,0)).  Returns logits (B, n_class) float32."""
    windows_size = tuple(windows_size)
    n_w = len(windows_size)
    h_max = max(windows_size)
    B, L = token_ids.shape
    E = embed_table.shape[1]
    F = conv_ws[0].shape[-1]
    n_class = fc_w.shape[-1]

    K = h_max * E                                   # fused contraction width (128 here)
    L_pad = ((L + 7) // 8) * 8                      # sublane-aligned conv-length axis
    NC = n_w * F                                    # real fused conv channels
    N_pad = ((max(NC, 128) + 127) // 128) * 128     # lane-dense conv/pool width
    C_pad = ((max(n_class, 128) + 127) // 128) * 128  # lane-dense logits width

    # ---------------- plain-JAX glue: embedding gather + im2col slab (bf16) -----------
    emb = jnp.take(embed_table, token_ids, axis=0).astype(jnp.float32)          # (B, L, E)
    emb_p = jnp.pad(emb, ((0, 0), (0, L_pad + h_max - 1 - L), (0, 0)))
    slab = jnp.concatenate([emb_p[:, k:k + L_pad, :] for k in range(h_max)],
                           axis=-1).astype(jnp.bfloat16)                        # (B, L_pad, K)

    # Fused, lane-padded conv weights / bias: window wi owns columns [wi*F, (wi+1)*F).
    W_all = jnp.zeros((K, N_pad), jnp.float32)
    b_all = jnp.zeros((1, N_pad), jnp.float32)
    valid_len = jnp.full((N_pad,), L_pad, jnp.int32)   # pad columns stay "valid" (all zero)
    for wi, h in enumerate(windows_size):
        W_all = W_all.at[:h * E, wi * F:(wi + 1) * F].set(
            conv_ws[wi].reshape(h * E, F).astype(jnp.float32))
        b_all = b_all.at[0, wi * F:(wi + 1) * F].set(conv_bs[wi].astype(jnp.float32))
        valid_len = valid_len.at[wi * F:(wi + 1) * F].set(L - h + 1)
    # Additive mask: -1e30 on positions past each window's valid conv length.
    neg_mask = jnp.where(jnp.arange(L_pad, dtype=jnp.int32)[:, None] < valid_len[None, :],
                         0.0, -1e30).astype(jnp.float32)                        # (L_pad, N_pad)

    fc_w_p = jnp.zeros((N_pad, C_pad), jnp.float32).at[:NC, :n_class].set(
        fc_w.astype(jnp.float32))
    fc_b_p = jnp.zeros((1, C_pad), jnp.float32).at[0, :n_class].set(
        fc_b.astype(jnp.float32))

    W_all = W_all.astype(jnp.bfloat16)
    fc_w_p = fc_w_p.astype(jnp.bfloat16)

    # ---------------- batch tiling ------------------------------------------------------
    if B >= batch_tile:
        TB = batch_tile
        B_pad = ((B + TB - 1) // TB) * TB
    else:
        TB = B
        B_pad = B
    if B_pad != B:
        slab = jnp.pad(slab, ((0, B_pad - B), (0, 0), (0, 0)))

    out = pl.pallas_call(
        _textcnn_kernel,
        out_shape=jax.ShapeDtypeStruct((B_pad, C_pad), jnp.float32),
        grid_spec=pltpu.PrefetchScalarGridSpec(
            num_scalar_prefetch=0,
            grid=(B_pad // TB,),
            in_specs=[
                pl.BlockSpec((TB, L_pad, K), lambda i: (i, 0, 0)),     # im2col slab (tiled)
                pl.BlockSpec((L_pad, N_pad), lambda i: (0, 0)),        # -inf mask (resident)
                pl.BlockSpec((K, N_pad), lambda i: (0, 0)),            # fused conv weights
                pl.BlockSpec((1, N_pad), lambda i: (0, 0)),            # fused conv bias
                pl.BlockSpec((N_pad, C_pad), lambda i: (0, 0)),        # padded FC weight
                pl.BlockSpec((1, C_pad), lambda i: (0, 0)),            # padded FC bias
            ],
            out_specs=pl.BlockSpec((TB, C_pad), lambda i: (i, 0)),
        ),
        compiler_params=pltpu.CompilerParams(
            dimension_semantics=("parallel",)),                         # megacore on v7x
    )(slab, neg_mask, W_all, b_all, fc_w_p, fc_b_p)

    return out[:B, :n_class]


def reference_forward(tokens, embed_table, conv_ws_pt, conv_bs, fc_w, fc_b, windows_size):
    """Pure-JAX reference using the PyTorch Conv1d weight layout (F, E, h)."""
    emb = jnp.take(embed_table, tokens, axis=0)                       # (B, L, E)
    L = emb.shape[1]
    feats = []
    for wi, h in enumerate(windows_size):
        w = conv_ws_pt[wi]                                            # (F, E, h)
        L_out = L - h + 1
        y = jnp.zeros((emb.shape[0], L_out, w.shape[0]), jnp.float32)
        for k in range(h):
            y = y + jnp.einsum('ble,fe->blf', emb[:, k:k + L_out, :], w[:, :, k])
        y = y + conv_bs[wi][None, None, :]
        y = jnp.where(y > 0, y, NEG_SLOPE * y)
        feats.append(jnp.max(y, axis=1))
    feat = jnp.concatenate(feats, axis=-1)
    return feat @ fc_w + fc_b[None, :]


if __name__ == "__main__":
    # Small, deterministic synthetic configuration consistent with TextCNN.__init__.
    vocab_size    = 50
    embedding_dim = 32
    feature_size  = 16
    windows_size  = (2, 3, 4)
    max_len       = 16
    n_class       = 4
    batch         = 16

    key = jax.random.PRNGKey(0)
    keys = jax.random.split(key, 4 + 2 * len(windows_size))

    # "word2vec" table (deterministic synthetic init, not a checkpoint load).
    embed_table = 0.1 * jax.random.normal(keys[0], (vocab_size, embedding_dim), jnp.float32)

    # Conv1d weights in PyTorch layout (out_channels=F, in_channels=E, kernel=h).
    conv_ws_pt = [0.1 * jax.random.normal(keys[1 + i], (feature_size, embedding_dim, h),
                                          jnp.float32)
                  for i, h in enumerate(windows_size)]
    conv_bs = [0.1 * jax.random.normal(keys[1 + len(windows_size) + i], (feature_size,),
                                       jnp.float32)
               for i in range(len(windows_size))]

    fc_w = 0.1 * jax.random.normal(keys[-3], (feature_size * len(windows_size), n_class),
                                   jnp.float32)
    fc_b = 0.1 * jax.random.normal(keys[-2], (n_class,), jnp.float32)

    tokens = jax.random.randint(keys[-1], (batch, max_len), 0, vocab_size, dtype=jnp.int32)

    # Explicit PyTorch (F, E, h) -> kernel (h, E, F) permute (addresses the layout concern).
    conv_ws = [jnp.transpose(w, (2, 1, 0)) for w in conv_ws_pt]

    out = textcnn_forward(tokens, embed_table, conv_ws, conv_bs, fc_w, fc_b, windows_size)
    out = jax.block_until_ready(out)

    assert out.shape == (batch, n_class) and out.dtype == jnp.float32

    # Numerical cross-check against a pure-JAX f32 reference (bf16 inputs -> loose tol).
    ref = reference_forward(tokens, embed_table, conv_ws_pt, conv_bs, fc_w, fc_b, windows_size)
    max_err = float(jnp.max(jnp.abs(out - ref)))
    assert max_err < 2e-2, f"max abs error vs reference: {max_err}"

    print("KERNEL_OK")
</pallas_src>

<mosaic_0001>
module attributes {stable_mosaic.version = 11 : i64} {
  func.func @_textcnn_kernel(%arg0: i32, %arg1: memref<8x16x128xbf16, #tpu.memory_space<vmem>>, %arg2: memref<16x128xf32, #tpu.memory_space<vmem>>, %arg3: memref<128x128xbf16, #tpu.memory_space<vmem>>, %arg4: memref<1x128xf32, #tpu.memory_space<vmem>>, %arg5: memref<128x128xbf16, #tpu.memory_space<vmem>>, %arg6: memref<1x128xf32, #tpu.memory_space<vmem>>, %arg7: memref<8x128xf32, #tpu.memory_space<vmem>>) attributes {dimension_semantics = [#tpu.dimension_semantics<parallel>], iteration_bounds = array<i64: 2>, scalar_prefetch = 0 : i64, scratch_operands = 0 : i64, tpu.core_type = #tpu.core_type<tc>, window_params = [{transform_indices = @transform_0, window_bounds = array<i64: 8, 16, 128>}, {pipeline_mode = #tpu.pipeline_mode<synchronous>, transform_indices = @transform_1, window_bounds = array<i64: 16, 128>}, {pipeline_mode = #tpu.pipeline_mode<synchronous>, transform_indices = @transform_2, window_bounds = array<i64: 128, 128>}, {pipeline_mode = #tpu.pipeline_mode<synchronous>, transform_indices = @transform_3, window_bounds = array<i64: 1, 128>}, {pipeline_mode = #tpu.pipeline_mode<synchronous>, transform_indices = @transform_4, window_bounds = array<i64: 128, 128>}, {pipeline_mode = #tpu.pipeline_mode<synchronous>, transform_indices = @transform_5, window_bounds = array<i64: 1, 128>}, {transform_indices = @transform_6, window_bounds = array<i64: 8, 128>}]} {
    %c0 = arith.constant 0 : index
    %c0_0 = arith.constant 0 : index
    %c0_1 = arith.constant 0 : index
    %0 = vector.load %arg1[%c0, %c0_0, %c0_1] : memref<8x16x128xbf16, #tpu.memory_space<vmem>>, vector<8x16x128xbf16>
    %1 = vector.shape_cast %0 : vector<8x16x128xbf16> to vector<128x128xbf16>
    %c0_2 = arith.constant 0 : index
    %c0_3 = arith.constant 0 : index
    %2 = vector.load %arg3[%c0_2, %c0_3] : memref<128x128xbf16, #tpu.memory_space<vmem>>, vector<128x128xbf16>
    %cst = arith.constant dense<0.000000e+00> : vector<128x128xf32>
    %3 = tpu.matmul %1, %2, %cst {dimension_numbers = #tpu.dot_dimension_numbers<[1], [0], [0], [1], [0, 0, 1, 1], [], []>} : vector<128x128xbf16>, vector<128x128xbf16>, vector<128x128xf32> -> vector<128x128xf32>
    %c0_4 = arith.constant 0 : index
    %c0_5 = arith.constant 0 : index
    %4 = vector.load %arg4[%c0_4, %c0_5] : memref<1x128xf32, #tpu.memory_space<vmem>>, vector<1x128xf32>
    %5 = vector.broadcast %4 : vector<1x128xf32> to vector<128x128xf32>
    %6 = arith.addf %3, %5 : vector<128x128xf32>
    %cst_6 = arith.constant 0.000000e+00 : f32
    %7 = vector.broadcast %cst_6 : f32 to vector<128x128xf32>
    %8 = arith.cmpf ogt, %6, %7 : vector<128x128xf32>
    %cst_7 = arith.constant 0.00999999977 : f32
    %9 = vector.broadcast %cst_7 : f32 to vector<128x128xf32>
    %10 = arith.mulf %9, %6 : vector<128x128xf32>
    %11 = arith.select %8, %6, %10 : vector<128x128xi1>, vector<128x128xf32>
    %12 = vector.shape_cast %11 : vector<128x128xf32> to vector<8x16x128xf32>
    %c0_8 = arith.constant 0 : index
    %c0_9 = arith.constant 0 : index
    %13 = vector.load %arg2[%c0_8, %c0_9] : memref<16x128xf32, #tpu.memory_space<vmem>>, vector<16x128xf32>
    %14 = vector.shape_cast %13 : vector<16x128xf32> to vector<1x16x128xf32>
    %15 = vector.broadcast %14 : vector<1x16x128xf32> to vector<8x16x128xf32>
    %16 = arith.addf %12, %15 : vector<8x16x128xf32>
    %cst_10 = arith.constant dense<0xFF800000> : vector<8x128xf32>
    %17 = vector.multi_reduction <maximumf>, %16, %cst_10 [1] : vector<8x16x128xf32> to vector<8x128xf32>
    %18 = arith.truncf %17 : vector<8x128xf32> to vector<8x128xbf16>
    %c0_11 = arith.constant 0 : index
    %c0_12 = arith.constant 0 : index
    %19 = vector.load %arg5[%c0_11, %c0_12] : memref<128x128xbf16, #tpu.memory_space<vmem>>, vector<128x128xbf16>
    %cst_13 = arith.constant dense<0.000000e+00> : vector<8x128xf32>
    %20 = tpu.matmul %18, %19, %cst_13 {dimension_numbers = #tpu.dot_dimension_numbers<[1], [0], [0], [1], [0, 0, 1, 1], [], []>} : vector<8x128xbf16>, vector<128x128xbf16>, vector<8x128xf32> -> vector<8x128xf32>
    %c0_14 = arith.constant 0 : index
    %c0_15 = arith.constant 0 : index
    %21 = vector.load %arg6[%c0_14, %c0_15] : memref<1x128xf32, #tpu.memory_space<vmem>>, vector<1x128xf32>
    %22 = vector.broadcast %21 : vector<1x128xf32> to vector<8x128xf32>
    %23 = arith.addf %20, %22 : vector<8x128xf32>
    %c0_16 = arith.constant 0 : index
    %c0_17 = arith.constant 0 : index
    %24 = vector.load %arg7[%c0_16, %c0_17] : memref<8x128xf32, #tpu.memory_space<vmem>>, vector<8x128xf32>
    tpu.vector_store %arg7[%c0_16, %c0_17], %23 {strides = array<i32>} : memref<8x128xf32, #tpu.memory_space<vmem>>, vector<8x128xf32>,
    return
  }
  func.func @transform_0(%arg0: i32) -> (i32, i32, i32) {
    %c0_i32 = arith.constant 0 : i32
    %c0_i32_0 = arith.constant 0 : i32
    %c0_i32_1 = arith.constant 0 : i32
    return %arg0, %c0_i32, %c0_i32_0 : i32, i32, i32
  }
  func.func @transform_1(%arg0: i32) -> (i32, i32) {
    %c0_i32 = arith.constant 0 : i32
    %c0_i32_0 = arith.constant 0 : i32
    %c0_i32_1 = arith.constant 0 : i32
    return %c0_i32, %c0_i32_0 : i32, i32
  }
  func.func @transform_2(%arg0: i32) -> (i32, i32) {
    %c0_i32 = arith.constant 0 : i32
    %c0_i32_0 = arith.constant 0 : i32
    %c0_i32_1 = arith.constant 0 : i32
    return %c0_i32, %c0_i32_0 : i32, i32
  }
  func.func @transform_3(%arg0: i32) -> (i32, i32) {
    %c0_i32 = arith.constant 0 : i32
    %c0_i32_0 = arith.constant 0 : i32
    %c0_i32_1 = arith.constant 0 : i32
    return %c0_i32, %c0_i32_0 : i32, i32
  }
  func.func @transform_4(%arg0: i32) -> (i32, i32) {
    %c0_i32 = arith.constant 0 : i32
    %c0_i32_0 = arith.constant 0 : i32
    %c0_i32_1 = arith.constant 0 : i32
    return %c0_i32, %c0_i32_0 : i32, i32
  }
  func.func @transform_5(%arg0: i32) -> (i32, i32) {
    %c0_i32 = arith.constant 0 : i32
    %c0_i32_0 = arith.constant 0 : i32
    %c0_i32_1 = arith.constant 0 : i32
    return %c0_i32, %c0_i32_0 : i32, i32
  }
  func.func @transform_6(%arg0: i32) -> (i32, i32) {
    %c0_i32 = arith.constant 0 : i32
    %c0_i32_0 = arith.constant 0 : i32
    return %arg0, %c0_i32 : i32, i32
  }
}

</mosaic_0001>

<bundles_post_ra>
// kernel: tpu_custom_call.1
= control target key start
LH: loop header
LB: loop body
LE: loop exit
PB: predicated region body
PF: predicated region fallthrough
CT: control target
= control target key end

     0   :  { %11 = vsyncpa [#allocation3], 0  ;;  %s1566_s0 = inlined_call_operand.hbm [shape: bf16[16,16,128], index: 0, kind: input, shape index: {}]   ;;  %s1567_s1 = inlined_call_operand.hbm [shape: f32[16,128], index: 1, kind: input, shape index: {}]   ;;  %s1568_s2 = inlined_call_operand.hbm [shape: bf16[128,128], index: 2, kind: input, shape index: {}]   ;;  %s1569_s3 = inlined_call_operand.vmem [shape: f32[1,128], index: 3, kind: input, shape index: {}]   ;;  %s1570_s4 = inlined_call_operand.hbm [shape: bf16[128,128], index: 4, kind: input, shape index: {}]   ;;  %s1571_s5 = inlined_call_operand.vmem [shape: f32[1,128], index: 5, kind: input, shape index: {}]   ;;  %s1572_s6 = inlined_call_operand.hbm [shape: f32[16,128], index: 6, kind: output, shape index: {}]  }
   0x1   :  { %13 = vsyncpa [#allocation3 + $0x1], 0 }
   0x2   :  { %14 = vsyncpa [#allocation6], 0 }
   0x3   :  { %15 = vsyncpa [#allocation9], 0 }
   0x4   :  { %16 = vsyncpa [#allocation4], 0 }
   0x5   :  { %18 = vsyncpa [#allocation4 + $0x1], 0  ;;  %s1343_s21 = smov 0   ;;  %s1345_s22 = smov 0  }
   0x6   :  { %s1347_s23 = smov 0   ;;  %s1349_s24 = smov 0  }
   0x7 LB: > { %s1364_s25 = sadd.s32 4294967295, %s1299_s24   ;;  %s864_s26 = sadd.s32 4294967294, %s1299_s24   ;;  %s1299_s24 = sphi %s1349_s24, %s1587_s24   ;;  %s1295_s23 = sphi %s1347_s23, %s1586_s23   ;;  %s1291_s22 = sphi %s1345_s22, %s1585_s22   ;;  %s1287_s21 = sphi %s1343_s21, %s1584_s21  }
   0x8   : > { %p44_p0 = scmp.ne.s32.totalorder %s1291_s22, %s1287_s21  ;;  %p45_p1 = scmp.eq.s32.totalorder %s1364_s25, 0 }
   0x9   : > { %p173_p2 = scmp.eq.s32.totalorder %s1364_s25, 1  ;;  %p179_p3 = scmp.eq.s32.totalorder %s864_s26, 1 }
   0xa   : > { %p1373_p4 = por %p45_p1, %p44_p0  ;;  %p865_p5 = scmp.ge.s32.totalorder %s1299_s24, 1 }
   0xb   : > { %p1378_p6 = por %p179_p3, %p44_p0  ;;  %p186_p7 = scmp.lt.s32.totalorder %s1299_s24, 3 }
   0xc   : > { %s197_s7 = sshll.u32 %s1567_s1, 4  ;;  %s1301_s9 = smov [#allocation5]   ;;  %s198_s7 = int_to_ptr.hbm [resolvable:$true] %s197_s7 }
   0xd   : > { %p1386_p8 = pnand %p865_p5, %p186_p7  ;;  %s199_s10 = sshll.u32 %s1301_s9, 4  ;;  %s200_s10 = int_to_ptr.vmem [resolvable:$true] %s199_s10 }
   0xe   : > { %s211_s14 = sshll.u32 %s1568_s2, 4  ;;  %s1302_s15 = smov 128   ;;  %s212_s14 = int_to_ptr.hbm [resolvable:$true] %s211_s14 }
   0xf   : > { %p1038_p9 = pneg %p1386_p8  ;;  %s1303_s16 = smov 8  }
  0x10   : > { %s1304_s17 = smov [#allocation7]   ;;  %s1573_s19 = smov 64  }
  0x11   : > { %p1394_p10 = pnand %p1038_p9, %p45_p1  ;;  %s213_s18 = sshll.u32 %s1304_s17, 4  ;;  %s214_s18 = int_to_ptr.vmem [resolvable:$true] %s213_s18 }
  0x12   : > { %s1574_s20 = smov 4   ;;  %s228_s30 = sshll.u32 %s1570_s4, 4  ;;  %s229_s30 = int_to_ptr.hbm [resolvable:$true] %s228_s30 }
  0x13   : > { %1041 = dma.hbm_to_vmem [thread:$0]  (!%p1394_p10), %s198_s7, 256, %s200_s10, [#allocation6], %s1302_s15, %s1302_s15, %s1303_s16  }
  0x14   : > { %1044 = dma.hbm_to_vmem [thread:$0]  (!%p1394_p10), %s212_s14, 1024, %s214_s18, [#allocation6], %s1573_s19, %s1573_s19, %s1574_s20  }
  0x15   : > { %s1307_s7 = smov [#allocation8]   ;;  %s1418_s10 = sadd.s32 1, %s1299_s24  }
  0x16   : > { %s230_s9 = sshll.u32 %s1307_s7, 4  ;;  %s28_s12 = ssub.s32 %s1299_s24, %s1418_s10  ;;  %s231_s9 = int_to_ptr.vmem [resolvable:$true] %s230_s9 }
  0x17   : > { %1047 = dma.hbm_to_vmem [thread:$0]  (!%p1394_p10), %s229_s30, 1024, %s231_s9, [#allocation9], %s1573_s19, %s1573_s19, %s1574_s20  }
  0x18   : > { %s31_s13 = sadd.s32 1, %s1295_s23  ;;  %p29_p12 = scmp.eq.s32.totalorder %s28_s12, 0 }
  0x19   : > { %p38_p13 = scmp.ne.s32.totalorder %s1295_s23, %s1291_s22  ;;  %p39_p0 = scmp.eq.s32.totalorder %s1299_s24, 0 }
  0x1a   : > { %s1427_s14 = scalar_select %p29_p12, %s1295_s23, %s31_s13  }
  0x1b   : > { %p1431_p3 = por %p173_p2, %p38_p13  ;;  %p1059_p5 = scmp.lt.s32.totalorder %s1299_s24, 2 }
  0x1c   : > { %s247_s11 = sand.u32 1, %s1295_s23   ;;  %s981_s16 = sshll.u32 %s1299_s24, 6 }
  0x1d   : > { %p40_p7 = por %p39_p0, %p38_p13  ;;  %s870_s17 = sshll.u32 %s247_s11, 6 }
  0x1e   : > { %s257_s29 = scalar_lea.hbm %s1566_s0, %s981_s16  ;;  %s251_s7 = scalar_lea.vmem [#allocation2], %s870_s17 }
  0x1f   : > { %s258_s30 = sshll.u32 %s257_s29, 4  ;;  %s260_s9 = sshll.u32 %s251_s7, 4  ;;  %s259_s30 = int_to_ptr.hbm [resolvable:$true] %s258_s30  ;;  %s261_s9 = int_to_ptr.vmem [resolvable:$true] %s260_s9 }
  0x20   : > { %p1441_p9 = pnand %p1059_p5, %p40_p7  ;;  %s248_s13 = scalar_lea.sflag [#allocation3], %s247_s11 }
  0x21   : > { %s1195_s19 = sshra.s32 %s259_s30, 4  ;;  %s1202_s17 = scalar_lea.hbm %s1566_s0, 128  ;;  %s1196_s19 = int_to_ptr.hbm [resolvable:$true] %s1195_s19 }
  0x22   : > { %s1197_s20 = scalar_lea.hbm %s1196_s19, 64  ;;  %p1199_p10 = pneg %p1441_p9 }
  0x23   : > { %p1198_p2 = scmp.ne.s32.totalorder %s1196_s19, %s1197_s20  ;;  %p1203_p0 = scmp.lt.s32.totalorder %s1196_s19, %s1566_s0 }
  0x24   : > { %p1204_p5 = scmp.lt.s32.totalorder %s1202_s17, %s1197_s20 }
  0x25   : > { %p1200_p12 = pnand %p1199_p10, %p1198_p2 }
  0x26   : > { %p1205_p7 = por %p1204_p5, %p1203_p0 }
  0x27   : > { %p1201_p13 = pneg %p1200_p12 }
  0x29   : > { %p1206_p11 = pnand %p1205_p7, %p1201_p13 }
  0x2b   : > { %1209 = shalt.err (!%p1206_p11)
}
  0x2c   : > { %s1581_s11 = smov 4   ;;  %s1582_s7 = smov 64  }
  0x2d   : > { %1051 = dma.hbm_to_vmem [thread:$0]  (!%p1441_p9), %s259_s30, 1024, %s261_s9, %s248_s13, %s1582_s7, %s1582_s7, %s1581_s11  }
  0x2e   : > { %272 = sbr.rel (%p1386_p8) target bundleno = 425 (0x1a9), region = 44  ;;  %s1461_s16 = sand.u32 (!%p1386_p8), 1, %s1291_s22  }
  0x2f   : > { %s875_s19 = sshll.u32 (!%p1386_p8), %s1461_s16, 6  ;;  %s275_s20 = scalar_lea.sflag (!%p1386_p8), [#allocation3], %s1461_s16 }
  0x30   : > { %s1465_s18 = scalar_lea.vmem (!%p1386_p8), [#allocation2], %s875_s19 }
  0x33   : > { %1270 = dma.done.wait (%p1373_p4), %s275_s20, 1024  }
  0x34   : > { %1272 = vsyncadd (%p1373_p4), %s275_s20, 4294966272 }
  0x35   : > { %1274 = dma.done.wait (%p45_p1), [#allocation6], 1280  }
  0x36   : > { %1276 = vsyncadd (%p45_p1), [#allocation6], 4294966016 }
  0x37   : > { %1278 = dma.done.wait (%p45_p1), [#allocation9], 1024  }
  0x38   : > { %1280 = vsyncadd (%p45_p1), [#allocation9], 4294966272  ;;  %v997_v0 = vld [vmem:[#allocation7 + $0x38] sm:$0xff]  ;;  %v996_v1 = vld [vmem:[#allocation7 + $0x30] sm:$0xff]  ;;  %s977_s30 = sshll.u32 %s1364_s25, 3  ;;  %s879_s9 = sshll.u32 %s1461_s16, 3 }
  0x39   : > { %456 = vmatpush.bf16.msra.mxu0 %v997_v0  ;;  %1006 = vmatpush.bf16.msra.mxu2 %v997_v0  ;;  %v995_v2 = vld [vmem:[#allocation7 + $0x28] sm:$0xff]  ;;  %v994_v3 = vld [vmem:[#allocation7 + $0x20] sm:$0xff]  ;;  %v993_v4 = vld [vmem:[#allocation7 + $0x18] sm:$0xff]  ;;  %s760_s17 = scalar_lea.hbm %s1572_s6, %s977_s30  ;;  %s322_s11 = scalar_lea.vmem [#allocation10], %s879_s9 }
  0x3a   : > { %1007 = vmatpush.bf16.msra.mxu3 %v997_v0  ;;  %v992_v5 = vld [vmem:[#allocation7 + $0x10] sm:$0xff]  ;;  %v991_v6 = vld [vmem:[#allocation7 + $0x8] sm:$0xff]  ;;  %v990_v7 = vld [vmem:[#allocation7] sm:$0xff]  ;;  %s762_s7 = sshll.u32 %s322_s11, 4  ;;  %s764_s19 = sshll.u32 %s760_s17, 4  ;;  %s763_s7 = int_to_ptr.vmem [resolvable:$true] %s762_s7  ;;  %s765_s19 = int_to_ptr.hbm [resolvable:$true] %s764_s19 }
  0x3b   : > { %v982_v8 = vld [vmem:[%s1465_s18] sm:$0xff]  ;;  %v984_v9 = vld [vmem:[%s1465_s18 + $0x10] sm:$0xff]  ;;  %v987_v10 = vld [vmem:[%s1465_s18 + $0x28] sm:$0xff]  ;;  %s750_s20 = scalar_lea.sflag [#allocation4], %s1461_s16  ;;  %s1239_s25 = sshra.s32 %s765_s19, 4  ;;  %s1240_s25 = int_to_ptr.hbm [resolvable:$true] %s1239_s25 }
  0x3c   : > { %v983_v11 = vld [vmem:[%s1465_s18 + $0x8] sm:$0xff]  ;;  %v985_v12 = vld [vmem:[%s1465_s18 + $0x18] sm:$0xff]  ;;  %v988_v13 = vld [vmem:[%s1465_s18 + $0x30] sm:$0xff]  ;;  %s1245_s30 = scalar_lea.hbm %s1572_s6, 16  ;;  %p1246_p11 = scmp.lt.s32.totalorder %s1240_s25, %s1572_s6 }
  0x3d   : > { %457 = vmatpush.bf16.msra.mxu0 %v996_v1  ;;  %1008 = vmatpush.bf16.msra.mxu2 %v996_v1  ;;  %v986_v14 = vld [vmem:[%s1465_s18 + $0x20] sm:$0xff]  ;;  %v989_v15 = vld [vmem:[%s1465_s18 + $0x38] sm:$0xff]  ;;  %v1005_v22 = vld [vmem:[#allocation8 + $0x38] sm:$0xff]  ;;  %s1241_s18 = scalar_lea.hbm %s1240_s25, 8 }
  0x3e   : > { %1009 = vmatpush.bf16.msra.mxu3 %v996_v1  ;;  %v1490_v20 = vld [vmem:[%s1569_s3] ss:$0 sm:$0xff]  ;;  %735 = vmatpush.bf16.msra.mxu1 %v1005_v22  ;;  %v1003_v36 = vld [vmem:[#allocation8 + $0x28] sm:$0xff]  ;;  %v1504_v49 = vld [vmem:[#allocation5 + $0x8] sm:$0xff]  ;;  %p1242_p1 = scmp.ne.s32.totalorder %s1240_s25, %s1241_s18  ;;  %p1247_p9 = scmp.lt.s32.totalorder %s1245_s30, %s1241_s18 }
  0x3f   : > { %v1004_v28 = vld [vmem:[#allocation8 + $0x30] sm:$0xff]  ;;  %v1002_v51 = vld [vmem:[#allocation8 + $0x20] sm:$0xff]  ;;  %v1001_v0 = vld [vmem:[#allocation8 + $0x18] sm:$0xff] }
  0x40   : > { %v1499_v43 = vld [vmem:[#allocation5] sm:$0xff]  ;;  %p1243_p4 = pnand %p1242_p1, %p1431_p3  ;;  %p1248_p2 = por %p1247_p9, %p1246_p11 }
  0x41   : > { %458 = vmatpush.bf16.msra.mxu0 %v995_v2  ;;  %1010 = vmatpush.bf16.msra.mxu2 %v995_v2 }
  0x42   : > { %1011 = vmatpush.bf16.msra.mxu3 %v995_v2  ;;  %736 = vmatpush.bf16.msra.mxu1 %v1004_v28  ;;  %p1244_p8 = pneg %p1243_p4 }
  0x44   : > { %p1249_p10 = pnand %p1248_p2, %p1244_p8 }
  0x45   : > { %459 = vmatpush.bf16.msra.mxu0 %v994_v3  ;;  %1012 = vmatpush.bf16.msra.mxu2 %v994_v3 }
  0x46   : > { %1013 = vmatpush.bf16.msra.mxu3 %v994_v3  ;;  %737 = vmatpush.bf16.msra.mxu1 %v1003_v36  ;;  %v998_v36 = vld [vmem:[#allocation8] sm:$0xff] }
  0x49   : > { %460 = vmatpush.bf16.msra.mxu0 %v993_v4  ;;  %1014 = vmatpush.bf16.msra.mxu2 %v993_v4 }
  0x4a   : > { %1015 = vmatpush.bf16.msra.mxu3 %v993_v4  ;;  %738 = vmatpush.bf16.msra.mxu1 %v1002_v51 }
  0x4d   : > { %461 = vmatpush.bf16.msra.mxu0 %v992_v5  ;;  %1016 = vmatpush.bf16.msra.mxu2 %v992_v5 }
  0x4e   : > { %1017 = vmatpush.bf16.msra.mxu3 %v992_v5  ;;  %739 = vmatpush.bf16.msra.mxu1 %v1001_v0 }
  0x51   : > { %462 = vmatpush.bf16.msra.mxu0 %v991_v6  ;;  %1018 = vmatpush.bf16.msra.mxu2 %v991_v6 }
  0x52   : > { %1019 = vmatpush.bf16.msra.mxu3 %v991_v6 }
  0x55   : > { %463 = vmatpush.bf16.msra.mxu0 %v990_v7  ;;  %1020 = vmatpush.bf16.msra.mxu2 %v990_v7 }
  0x56   : > { %1021 = vmatpush.bf16.msra.mxu3 %v990_v7 }
  0x58   : > { %464 = vmatmul.bf16.vlgmr.msra.gmra.mxu0 %v982_v8  ;;  %474 = vmatmul.bf16.vlgmr.msra.gmra.mxu2 %v984_v9  ;;  %v1000_v9 = vld [vmem:[#allocation8 + $0x10] sm:$0xff] }
  0x59   : > { %489 = vmatmul.bf16.vlgmr.msra.gmra.mxu3 %v987_v10  ;;  %740 = vmatpush.bf16.msra.mxu1 %v1000_v9 }
  0x68   : > { %469 = vmatmul.bf16.gmra.mxu0 %v983_v11  ;;  %479 = vmatmul.bf16.gmra.mxu2 %v985_v12 }
  0x69   : > { %494 = vmatmul.bf16.gmra.mxu3 %v988_v13 }
  0x78   : > { %484 = vmatmul.bf16.gmra.mxu2 %v986_v14 }
  0x79   : > { %499 = vmatmul.bf16.gmra.mxu3 %v989_v15 }
  0xd5   : > { %v465_v16 = vpop.f32.mrf.mxu0 }
  0xd6   : > { %v466_v23 = vadd.f32 %v1490_v20, %v465_v16 }
  0xd8   : > { %v521_v29 = vmul.f32 0.01, %v466_v23  ;;  %vm505_vm0 = vcmp.gt.f32.partialorder %v466_v23, 0.0 }
  0xda   : > { %v537_v37 = vsel %vm505_vm0, %v466_v23, %v521_v29  ;;  %vm671_vm0 = vcmask 1041409  }
  0xdb   : > { %v475_v17 = vpop.f32.mrf.mxu2  ;;  %v555_v47 = vadd.f32 %v1499_v43, %v537_v37 }
  0xdc   : > { %v490_v18 = vpop.f32.mrf.mxu3  ;;  %v476_v31 = vadd.f32 %v1490_v20, %v475_v17 }
  0xdd   : > { %v467_v19 = vpop.f32.mrf.mxu0  ;;  %v491_v41 = vadd.f32 %v1490_v20, %v490_v18 }
  0xde   : > { %v468_v27 = vadd.f32 %v1490_v20, %v467_v19  ;;  %v525_v40 = vmul.f32 0.01, %v476_v31  ;;  %vm509_vm4 = vcmp.gt.f32.partialorder %v476_v31, 0.0 }
  0xdf   : > { %v531_v56 = vmul.f32 0.01, %v491_v41  ;;  %vm515_vm7 = vcmp.gt.f32.partialorder %v491_v41, 0.0 }
  0xe0   : > { %v522_v33 = vmul.f32 0.01, %v468_v27  ;;  %vm506_vm2 = vcmp.gt.f32.partialorder %v468_v27, 0.0  ;;  %v541_v55 = vsel %vm509_vm4, %v476_v31, %v525_v40  ;;  %vm679_vm4 = vcmask 1045509  }
  0xe1   : > { %v559_v1 = vadd.f32 %v1499_v43, %v541_v55  ;;  %v547_v6 = vsel %vm515_vm7, %v491_v41, %v531_v56 }
  0xe2   : > { %v538_v48 = vsel %vm506_vm2, %v468_v27, %v522_v33  ;;  %v565_v19 = vadd.f32 %v1499_v43, %v547_v6  ;;  %vm675_vm2 = vcmask 1043459  }
  0xe3   : > { %v477_v21 = vpop.f32.mrf.mxu2  ;;  %v556_v58 = vadd.f32 %v1504_v49, %v538_v48 }
  0xe4   : > { %v492_v24 = vpop.f32.mrf.mxu3  ;;  %v478_v30 = vadd.f32 %v1490_v20, %v477_v21 }
  0xe5   : > { %v470_v25 = vpop.f32.mrf.mxu0  ;;  %v493_v34 = vadd.f32 %v1490_v20, %v492_v24  ;;  %v571_v10 = vmax.f32 %v555_v47, %v556_v58  ;;  %v999_v24 = vld [vmem:[#allocation8 + $0x8] sm:$0xff] }
  0xe6   : > { %v471_v26 = vadd.f32 %v1490_v20, %v470_v25  ;;  %v526_v38 = vmul.f32 0.01, %v478_v30  ;;  %vm510_vm3 = vcmp.gt.f32.partialorder %v478_v30, 0.0  ;;  %741 = vmatpush.bf16.msra.mxu1 %v999_v24 }
  0xe7   : > { %v532_v50 = vmul.f32 0.01, %v493_v34  ;;  %vm516_vm6 = vcmp.gt.f32.partialorder %v493_v34, 0.0  ;;  %v572_v25 = vrot.slane %v571_v10, 4 }
  0xe8   : > { %v523_v32 = vmul.f32 0.01, %v471_v26  ;;  %vm507_vm1 = vcmp.gt.f32.partialorder %v471_v26, 0.0  ;;  %v542_v52 = vsel %vm510_vm3, %v478_v30, %v526_v38  ;;  %vm677_vm3 = vcmask 1044484  }
  0xe9   : > { %v560_v61 = vadd.f32 %v1504_v49, %v542_v52  ;;  %v548_v2 = vsel %vm516_vm6, %v493_v34, %v532_v50  ;;  %v573_v37 = vmax.f32 %v571_v10, %v572_v25  ;;  %vm683_vm6 = vcmask 1047559  }
  0xea   : > { %v539_v44 = vsel %vm507_vm1, %v471_v26, %v523_v32  ;;  %v566_v14 = vadd.f32 %v1504_v49, %v548_v2  ;;  %742 = vmatpush.bf16.msra.mxu1 %v998_v36  ;;  %vm673_vm1 = vcmask 1042434  }
  0xeb   : > { %v480_v35 = vpop.f32.mrf.mxu2  ;;  %v557_v57 = vadd.f32 %v1499_v43, %v539_v44  ;;  %v585_v13 = vmax.f32 %v559_v1, %v560_v61 }
  0xec   : > { %v495_v39 = vpop.f32.mrf.mxu3  ;;  %v481_v45 = vadd.f32 %v1490_v20, %v480_v35  ;;  %v606_v28 = vmax.f32 %v565_v19, %v566_v14 }
  0xed   : > { %v472_v42 = vpop.f32.mrf.mxu0  ;;  %v496_v53 = vadd.f32 %v1490_v20, %v495_v39  ;;  %v586_v27 = vrot.slane %v585_v13, 4 }
  0xee   : > { %v473_v46 = vadd.f32 %v1490_v20, %v472_v42  ;;  %v527_v59 = vmul.f32 0.01, %v481_v45  ;;  %vm511_vm8 = vcmp.gt.f32.partialorder %v481_v45, 0.0  ;;  %v607_v40 = vrot.slane %v606_v28, 4 }
  0xef   : > { %v533_v3 = vmul.f32 0.01, %v496_v53  ;;  %vm517_vm9 = vcmp.gt.f32.partialorder %v496_v53, 0.0  ;;  %v587_v39 = vmax.f32 %v585_v13, %v586_v27 }
  0xf0   : > { %vm508_vm5 = vcmp.gt.f32.partialorder %v473_v46, 0.0  ;;  %v524_v54 = vmul.f32 0.01, %v473_v46  ;;  %v543_v11 = vsel %vm511_vm8, %v481_v45, %v527_v59  ;;  %v608_v50 = vmax.f32 %v606_v28, %v607_v40 }
  0xf1   : > { %v549_v16 = vsel %vm517_vm9, %v496_v53, %v533_v3  ;;  %v561_v21 = vadd.f32 %v1499_v43, %v543_v11  ;;  %v588_v48 = vrot.slane %v587_v39, 2 }
  0xf2   : > { %v540_v60 = vsel %vm508_vm5, %v473_v46, %v524_v54  ;;  %v567_v29 = vadd.f32 %v1499_v43, %v549_v16  ;;  %v574_v46 = vrot.slane %v573_v37, 2  ;;  %vm681_vm5 = vcmask 1046534  }
  0xf3   : > { %v558_v62 = vadd.f32 %v1504_v49, %v540_v60  ;;  %v482_v63 = vpop.f32.mrf.mxu2  ;;  %v589_v1 = vmax.f32 %v587_v39, %v588_v48 }
  0xf4   : > { %v483_v4 = vadd.f32 %v1490_v20, %v482_v63  ;;  %v497_v5 = vpop.f32.mrf.mxu3  ;;  %v575_v59 = vmax.f32 %v573_v37, %v574_v46 }
  0xf5   : > { %v578_v7 = vmax.f32 %v557_v57, %v558_v62  ;;  %v498_v8 = vadd.f32 %v1490_v20, %v497_v5  ;;  %v609_v62 = vrot.slane %v608_v50, 2  ;;  %v590_v16 = vrot.slane %v589_v1, 1 }
  0xf6   : > { %vm512_vm10 = vcmp.gt.f32.partialorder %v483_v4, 0.0  ;;  %v528_v12 = vmul.f32 0.01, %v483_v4  ;;  %v576_v9 = vrot.slane %v575_v59, 1 }
  0xf7   : > { %vm518_vm11 = vcmp.gt.f32.partialorder %v498_v8, 0.0  ;;  %v534_v15 = vmul.f32 0.01, %v498_v8  ;;  %v579_v17 = vrot.slane %v578_v7, 4  ;;  %v591_v27 = vmax.f32 %v589_v1, %v590_v16 }
  0xf8   : > { %v544_v18 = vsel %vm512_vm10, %v483_v4, %v528_v12  ;;  %v610_v12 = vmax.f32 %v608_v50, %v609_v62  ;;  %v577_v19 = vmax.f32 %v575_v59, %v576_v9  ;;  %v1104_v62 = vld [vmem:[%s1571_s5] ss:$0 sm:$0xff] }
  0xf9   : > { %v562_v22 = vadd.f32 %v1504_v49, %v544_v18  ;;  %v550_v23 = vsel %vm518_vm11, %v498_v8, %v534_v15  ;;  %v580_v32 = vmax.f32 %v578_v7, %v579_v17 }
  0xfa   : > { %v568_v26 = vadd.f32 %v1504_v49, %v550_v23 }
  0xfb   : > { %v592_v30 = vmax.f32 %v561_v21, %v562_v22  ;;  %v485_v31 = vpop.f32.mrf.mxu2  ;;  %v581_v42 = vrot.slane %v580_v32, 2 }
  0xfc   : > { %v500_v33 = vpop.f32.mrf.mxu3  ;;  %v613_v35 = vmax.f32 %v567_v29, %v568_v26  ;;  %v486_v38 = vadd.f32 %v1490_v20, %v485_v31  ;;  %v611_v26 = vrot.slane %v610_v12, 1  ;;  %v627_v29 = vpack.c.bf16 %v577_v19, %v577_v19 }
  0xfd   : > { %v593_v34 = vrot.slane %v592_v30, 4  ;;  %v501_v41 = vadd.f32 %v1490_v20, %v500_v33  ;;  %v582_v53 = vmax.f32 %v580_v32, %v581_v42 }
  0xfe   : > { %v614_v45 = vrot.slane %v613_v35, 4  ;;  %v529_v47 = vmul.f32 0.01, %v486_v38  ;;  %vm513_vm12 = vcmp.gt.f32.partialorder %v486_v38, 0.0  ;;  %v612_v33 = vmax.f32 %v610_v12, %v611_v26 }
  0xff   : > { %v594_v44 = vmax.f32 %v592_v30, %v593_v34  ;;  %v535_v51 = vmul.f32 0.01, %v501_v41  ;;  %vm519_vm13 = vcmp.gt.f32.partialorder %v501_v41, 0.0  ;;  %v583_v2 = vrot.slane %v582_v53, 1 }
 0x100   : > { %v615_v57 = vmax.f32 %v613_v35, %v614_v45  ;;  %v545_v60 = vsel %vm513_vm12, %v486_v38, %v529_v47  ;;  %v629_v35 = vpack.c.bf16 %v591_v27, %v591_v27  ;;  %v663_v38 = vunpack.c.l.b16 %v627_v29 }
 0x101   : > { %v595_v54 = vrot.slane %v594_v44, 2  ;;  %v551_v63 = vsel %vm519_vm13, %v501_v41, %v535_v51  ;;  %v563_v6 = vadd.f32 %v1499_v43, %v545_v60  ;;  %v584_v13 = vmax.f32 %v582_v53, %v583_v2 }
 0x102   : > { %v616_v5 = vrot.slane %v615_v57, 2  ;;  %v665_v46 = vunpack.c.l.b16 %v629_v35 }
 0x103   : > { %v487_v52 = vpop.f32.mrf.mxu2  ;;  %v596_v3 = vmax.f32 %v594_v44, %v595_v54  ;;  %v628_v23 = vpack.c.bf16 %v584_v13, %v584_v13  ;;  %v632_v44 = vpack.c.bf16 %v612_v33, %v612_v33 }
 0x104   : > { %v488_v55 = vadd.f32 %v1490_v20, %v487_v52  ;;  %v502_v56 = vpop.f32.mrf.mxu3  ;;  %v617_v18 = vmax.f32 %v615_v57, %v616_v5 }
 0x105   : > { %v503_v58 = vadd.f32 %v1490_v20, %v502_v56  ;;  %v569_v20 = vadd.f32 %v1499_v43, %v551_v63  ;;  %v597_v14 = vrot.slane %v596_v3, 1  ;;  %v664_v31 = vunpack.c.l.b16 %v628_v23 }
 0x106   : > { %vm514_vm14 = vcmp.gt.f32.partialorder %v488_v55, 0.0  ;;  %v530_v61 = vmul.f32 0.01, %v488_v55  ;;  %v618_v43 = vrot.slane %v617_v18, 1  ;;  %v668_v53 = vunpack.c.l.b16 %v632_v44 }
 0x107   : > { %vm520_vm15 = vcmp.gt.f32.partialorder %v503_v58, 0.0  ;;  %v536_v0 = vmul.f32 0.01, %v503_v58  ;;  %v598_v24 = vmax.f32 %v596_v3, %v597_v14  ;;  %v672_v45 = vsel %vm671_vm0, %v664_v31, %v663_v38 }
 0x108   : > { %v546_v4 = vsel %vm514_vm14, %v488_v55, %v530_v61  ;;  %v619_v37 = vmax.f32 %v617_v18, %v618_v43  ;;  %v674_v52 = vsel %vm673_vm1, %v665_v46, %v672_v45 }
 0x109   : > { %v564_v7 = vadd.f32 %v1504_v49, %v546_v4  ;;  %v552_v8 = vsel %vm520_vm15, %v503_v58, %v536_v0  ;;  %v630_v32 = vpack.c.bf16 %v598_v24, %v598_v24 }
 0x10a   : > { %v570_v10 = vadd.f32 %v1504_v49, %v552_v8  ;;  %v633_v48 = vpack.c.bf16 %v619_v37, %v619_v37 }
 0x10b   : > { %v599_v11 = vmax.f32 %v563_v6, %v564_v7  ;;  %v666_v41 = vunpack.c.l.b16 %v630_v32 }
 0x10c   : > { %v620_v15 = vmax.f32 %v569_v20, %v570_v10  ;;  %v669_v55 = vunpack.c.l.b16 %v633_v48 }
 0x10d   : > { %v600_v17 = vrot.slane %v599_v11, 4  ;;  %v676_v54 = vsel %vm675_vm2, %v666_v41, %v674_v52 }
 0x10e   : > { %v621_v21 = vrot.slane %v620_v15, 4 }
 0x10f   : > { %v601_v22 = vmax.f32 %v599_v11, %v600_v17 }
 0x110   : > { %v622_v25 = vmax.f32 %v620_v15, %v621_v21 }
 0x111   : > { %v602_v28 = vrot.slane %v601_v22, 2 }
 0x112   : > { %v623_v49 = vrot.slane %v622_v25, 2 }
 0x113   : > { %v603_v30 = vmax.f32 %v601_v22, %v602_v28 }
 0x114   : > { %v624_v34 = vmax.f32 %v622_v25, %v623_v49 }
 0x115   : > { %v604_v36 = vrot.slane %v603_v30, 1 }
 0x116   : > { %v625_v39 = vrot.slane %v624_v34, 1 }
 0x117   : > { %v605_v40 = vmax.f32 %v603_v30, %v604_v36 }
 0x118   : > { %v626_v42 = vmax.f32 %v624_v34, %v625_v39 }
 0x119   : > { %v631_v47 = vpack.c.bf16 %v605_v40, %v605_v40 }
 0x11a   : > { %v634_v50 = vpack.c.bf16 %v626_v42, %v626_v42 }
 0x11b   : > { %v667_v51 = vunpack.c.l.b16 %v631_v47 }
 0x11c   : > { %v670_v57 = vunpack.c.l.b16 %v634_v50 }
 0x11d   : > { %v678_v56 = vsel %vm677_vm3, %v667_v51, %v676_v54 }
 0x11e   : > { %v680_v58 = vsel %vm679_vm4, %v668_v53, %v678_v56 }
 0x11f   : > { %v682_v59 = vsel %vm681_vm5, %v669_v55, %v680_v58 }
 0x120   : > { %v684_v60 = vsel %vm683_vm6, %v670_v57, %v682_v59 }
 0x121   : > { %v685_v61 = vpack.c.b16 %v684_v60, %v684_v60 }
 0x123   : > { %743 = vmatmul.bf16.vlgmr.msra.gmra.mxu1 %v685_v61 }
 0x1a0   : > { %v744_v63 = vpop.f32.mrf.mxu1 }
 0x1a1   : > { %v745_v0 = vadd.f32 %v1104_v62, %v744_v63 }
 0x1a3   : > { %748 = vst [vmem:[%s322_s11] sm:$0xff] %v745_v0 }
 0x1a4   : > { %1252 = shalt.err (!%p1249_p10)
}
 0x1a5   : > { %1036 = dma.vmem_to_hbm [thread:$0]  (%p1431_p3), %s763_s7, 128, %s765_s19, %s750_s20  }
 0x1a8   : > { %v746_v1 = vpop.f32.mrf.mxu1 }
 0x1a9 PF: > { %s776_s16 = sand.u32 1, %s1287_s21   ;;  %p1583_p12 = scmp.ge.s32.totalorder %s1299_s24, 2 }
 0x1aa   : > { %s777_s13 = scalar_lea.sflag [#allocation4], %s776_s16 }
 0x1ab   : > { %p1053_p13 = pnand %p1583_p12, %p1378_p6 }
 0x1ad   : > { %p1054_p0 = pneg %p1053_p13 }
 0x1af   : > { %1282 = dma.done.wait (%p1054_p0), %s777_s13, 128  }
 0x1b0   : > { %1284 = vsyncadd (%p1054_p0), %s777_s13, 4294967168  ;;  %p21_p5 = scmp.ge.s32.totalorder %s1418_s10, 4   ;;  %s1584_s21 = smov %s1291_s22 }
 0x1b1   : > { %s1585_s22 = smov %s1295_s23  ;;  %s1586_s23 = smov %s1427_s14 }
 0x1b2   : > { %s1587_s24 = smov %s1418_s10  ;;  %23 = sbr.rel (!%p21_p5) target bundleno = 7 (0x7), region = 101 }
 0x1b7   :  { %783 = vsyncpa [#allocation3], 1 }
 0x1b8   :  { %785 = vsyncpa [#allocation3 + $0x1], 1 }
 0x1b9   :  { %786 = vsyncpa [#allocation6], 1 }
 0x1ba   :  { %787 = vsyncpa [#allocation9], 1 }
 0x1bb   :  { %788 = vsyncpa [#allocation4], 1 }
 0x1bc   :  { %790 = vsyncpa [#allocation4 + $0x1], 1 }

</bundles_post_ra>
